<compile_context>
chip_gen: v5e
topology: v5e:2x2
jax: 0.10.0
libtpu: 0.0.40
codegen_flags: <defaults>
</compile_context>

<pallas_src>
import functools
import math

import jax
import jax.numpy as jnp
from jax import lax
from jax.experimental import pallas as pl
from jax.experimental.pallas import tpu as pltpu


# Sublane granularity by element size (f32 -> 8, bf16 -> 16, int8/fp8 -> 32).
_SUBLANE_FOR_BYTES = {4: 8, 2: 16, 1: 32}

# Conservative working-set budget (fits comfortably inside the 32 MiB default
# scoped VMEM on v6e/v7x; leaves headroom on v7x's 64 MiB physical VMEM).
_VMEM_WORKSET_BUDGET = 20 * 1024 * 1024
_VMEM_LIMIT_BYTES = 32 * 1024 * 1024
_MAX_TILE_BATCH = 1024


def _round_up(x, m):
    return ((x + m - 1) // m) * m


def _choose_tile_batch(batch, in_dim_p, out_dim_p, rank, dtype_bytes):
    """Largest batch tile (multiple of sublane granularity) that fits the
    double-buffered VMEM working set."""
    sub = _SUBLANE_FOR_BYTES.get(dtype_bytes, 8)
    rank_p = max(_round_up(rank, sub), sub)
    # Weight residency (counted double-buffered to be conservative).
    w_bytes = 2 * rank_p * (in_dim_p + out_dim_p) * dtype_bytes
    # Per-row cost of the x tile + out tile, each double-buffered.
    per_row = 2 * (in_dim_p + out_dim_p) * dtype_bytes
    avail = max(_VMEM_WORKSET_BUDGET - w_bytes, per_row * sub)
    tile = min(_MAX_TILE_BATCH, avail // per_row)
    tile = max(sub, (tile // sub) * sub)
    # Never larger than the (sublane-padded) batch itself.
    tile = min(tile, _round_up(batch, sub))
    return int(tile)


def _lora_kernel(x_ref, wa_t_ref, wb_ref, o_ref, *, alpha):
    # x_ref:    (tile_batch, in_dim_p)
    # wa_t_ref: (rank, in_dim_p)      -- W_a transposed, in_dim on lanes
    # wb_ref:   (rank, out_dim_p)
    # o_ref:    (tile_batch, out_dim_p)
    x = x_ref[...]
    # (tb, in_dim) x (rank, in_dim) contracted over in_dim -> (tb, rank).
    xa = lax.dot_general(
        x, wa_t_ref[...],
        dimension_numbers=(((1,), (1,)), ((), ())),
        preferred_element_type=jnp.float32,
    )
    # Scale the small (tb, rank) intermediate instead of the big output.
    xa = xa * alpha
    out = jnp.dot(
        xa.astype(wb_ref.dtype), wb_ref[...],
        preferred_element_type=jnp.float32,
    )
    o_ref[...] = out.astype(o_ref.dtype)


def lora_forward(x, w_a, w_b, alpha, *, tile_batch=None):
    """Computes alpha * (x @ w_a @ w_b) with a Pallas TPU kernel.

    x:   [batch, in_dim]
    w_a: [in_dim, rank]
    w_b: [rank, out_dim]
    """
    batch, in_dim = x.shape
    in_dim_a, rank = w_a.shape
    rank_b, out_dim = w_b.shape
    assert in_dim == in_dim_a and rank == rank_b

    dtype = x.dtype
    dtype_bytes = jnp.dtype(dtype).itemsize
    sub = _SUBLANE_FOR_BYTES.get(dtype_bytes, 8)

    # Lane-dense padding of the contraction / output lane dims.
    in_dim_p = _round_up(in_dim, 128)
    out_dim_p = _round_up(out_dim, 128)

    if tile_batch is None:
        tile_batch = _choose_tile_batch(batch, in_dim_p, out_dim_p, rank,
                                        dtype_bytes)
    else:
        tile_batch = max(sub, _round_up(int(tile_batch), sub))

    batch_p = _round_up(batch, tile_batch)

    # Pad inputs (all padding is zeros, so the math is unchanged; these are
    # no-ops for realistic, already-aligned LoRA shapes).
    x_p = x
    if (batch_p, in_dim_p) != (batch, in_dim):
        x_p = jnp.pad(x, ((0, batch_p - batch), (0, in_dim_p - in_dim)))

    # W_a transposed: rank on sublanes, in_dim on lanes (dense DMA, tiny VMEM).
    wa_t = jnp.transpose(w_a).astype(dtype)
    if in_dim_p != in_dim:
        wa_t = jnp.pad(wa_t, ((0, 0), (0, in_dim_p - in_dim)))

    wb_p = w_b.astype(dtype)
    if out_dim_p != out_dim:
        wb_p = jnp.pad(wb_p, ((0, 0), (0, out_dim_p - out_dim)))

    grid = (batch_p // tile_batch,)

    cost = pl.CostEstimate(
        flops=2 * batch * rank * (in_dim + out_dim),
        transcendentals=0,
        bytes_accessed=(batch * (in_dim + out_dim)
                        + rank * (in_dim + out_dim)) * dtype_bytes,
    )

    out_p = pl.pallas_call(
        functools.partial(_lora_kernel, alpha=float(alpha)),
        out_shape=jax.ShapeDtypeStruct((batch_p, out_dim_p), dtype),
        grid_spec=pltpu.PrefetchScalarGridSpec(
            num_scalar_prefetch=0,
            grid=grid,
            in_specs=[
                pl.BlockSpec((tile_batch, in_dim_p), lambda i: (i, 0)),
                pl.BlockSpec((rank, in_dim_p), lambda i: (0, 0)),
                pl.BlockSpec((rank, out_dim_p), lambda i: (0, 0)),
            ],
            out_specs=pl.BlockSpec((tile_batch, out_dim_p), lambda i: (i, 0)),
        ),
        compiler_params=pltpu.CompilerParams(
            dimension_semantics=("parallel",),
            vmem_limit_bytes=_VMEM_LIMIT_BYTES,
        ),
        cost_estimate=cost,
    )(x_p, wa_t, wb_p)

    if (batch_p, out_dim_p) != (batch, out_dim):
        out_p = out_p[:batch, :out_dim]
    return out_p


if __name__ == "__main__":
    # Module hyperparameters (small, consistent with LoRALayer.__init__).
    in_dim, out_dim, rank, alpha = 32, 32, 4, 2.0
    batch = 8

    key = jax.random.PRNGKey(0)
    k_x, k_wa, k_wb = jax.random.split(key, 3)

    # Deterministic parameter init mirroring the PyTorch module:
    #   W_a = randn(in_dim, rank) / sqrt(rank);  W_b = zeros(rank, out_dim)
    std_dev = 1.0 / math.sqrt(rank)
    w_a = jax.random.normal(k_wa, (in_dim, rank), dtype=jnp.float32) * std_dev
    w_b = jnp.zeros((rank, out_dim), dtype=jnp.float32)

    x = jax.random.normal(k_x, (batch, in_dim), dtype=jnp.float32)

    # Spec-faithful init (W_b zeros -> output is exactly zero).
    out = jax.block_until_ready(lora_forward(x, w_a, w_b, alpha))
    ref = alpha * (x @ w_a @ w_b)
    assert out.shape == (batch, out_dim)
    assert jnp.allclose(out, ref, atol=1e-5, rtol=1e-5)

    # Non-trivial check with a random W_b so the math is actually exercised.
    w_b_rand = jax.random.normal(k_wb, (rank, out_dim), dtype=jnp.float32)
    out2 = jax.block_until_ready(lora_forward(x, w_a, w_b_rand, alpha))
    ref2 = alpha * (x @ w_a @ w_b_rand)
    assert jnp.allclose(out2, ref2, atol=1e-4, rtol=1e-4)

    print("KERNEL_OK")
</pallas_src>

<mosaic_0001>
module attributes {stable_mosaic.version = 11 : i64} {
  func.func @_lora_kernel(%arg0: i32, %arg1: memref<8x128xf32, #tpu.memory_space<vmem>>, %arg2: memref<4x128xf32, #tpu.memory_space<vmem>>, %arg3: memref<4x128xf32, #tpu.memory_space<vmem>>, %arg4: memref<8x128xf32, #tpu.memory_space<vmem>>) attributes {dimension_semantics = [#tpu.dimension_semantics<parallel>], iteration_bounds = array<i64: 1>, scalar_prefetch = 0 : i64, scratch_operands = 0 : i64, tpu.core_type = #tpu.core_type<tc>, window_params = [{transform_indices = @transform_0, window_bounds = array<i64: 8, 128>}, {pipeline_mode = #tpu.pipeline_mode<synchronous>, transform_indices = @transform_1, window_bounds = array<i64: 4, 128>}, {pipeline_mode = #tpu.pipeline_mode<synchronous>, transform_indices = @transform_2, window_bounds = array<i64: 4, 128>}, {transform_indices = @transform_3, window_bounds = array<i64: 8, 128>}]} {
    %c0 = arith.constant 0 : index
    %c0_0 = arith.constant 0 : index
    %0 = vector.load %arg1[%c0, %c0_0] : memref<8x128xf32, #tpu.memory_space<vmem>>, vector<8x128xf32>
    %c0_1 = arith.constant 0 : index
    %c0_2 = arith.constant 0 : index
    %1 = vector.load %arg2[%c0_1, %c0_2] : memref<4x128xf32, #tpu.memory_space<vmem>>, vector<4x128xf32>
    %cst = arith.constant dense<0.000000e+00> : vector<8x4xf32>
    %2 = tpu.matmul %0, %1, %cst {dimension_numbers = #tpu.dot_dimension_numbers<[1], [1], [0], [0], [0, 0, 1, 0], [], []>} : vector<8x128xf32>, vector<4x128xf32>, vector<8x4xf32> -> vector<8x4xf32>
    %cst_3 = arith.constant 2.000000e+00 : f32
    %3 = vector.broadcast %cst_3 : f32 to vector<8x4xf32>
    %4 = arith.mulf %2, %3 : vector<8x4xf32>
    %c0_4 = arith.constant 0 : index
    %c0_5 = arith.constant 0 : index
    %5 = vector.load %arg3[%c0_4, %c0_5] : memref<4x128xf32, #tpu.memory_space<vmem>>, vector<4x128xf32>
    %cst_6 = arith.constant dense<0.000000e+00> : vector<8x128xf32>
    %6 = tpu.matmul %4, %5, %cst_6 {dimension_numbers = #tpu.dot_dimension_numbers<[1], [0], [0], [1], [0, 0, 1, 1], [], []>} : vector<8x4xf32>, vector<4x128xf32>, vector<8x128xf32> -> vector<8x128xf32>
    %c0_7 = arith.constant 0 : index
    %c0_8 = arith.constant 0 : index
    %7 = vector.load %arg4[%c0_7, %c0_8] : memref<8x128xf32, #tpu.memory_space<vmem>>, vector<8x128xf32>
    tpu.vector_store %arg4[%c0_7, %c0_8], %6 {strides = array<i32>} : memref<8x128xf32, #tpu.memory_space<vmem>>, vector<8x128xf32>,
    return
  }
  func.func @transform_0(%arg0: i32) -> (i32, i32) {
    %c0_i32 = arith.constant 0 : i32
    %c0_i32_0 = arith.constant 0 : i32
    return %arg0, %c0_i32 : i32, i32
  }
  func.func @transform_1(%arg0: i32) -> (i32, i32) {
    %c0_i32 = arith.constant 0 : i32
    %c0_i32_0 = arith.constant 0 : i32
    %c0_i32_1 = arith.constant 0 : i32
    return %c0_i32, %c0_i32_0 : i32, i32
  }
  func.func @transform_2(%arg0: i32) -> (i32, i32) {
    %c0_i32 = arith.constant 0 : i32
    %c0_i32_0 = arith.constant 0 : i32
    %c0_i32_1 = arith.constant 0 : i32
    return %c0_i32, %c0_i32_0 : i32, i32
  }
  func.func @transform_3(%arg0: i32) -> (i32, i32) {
    %c0_i32 = arith.constant 0 : i32
    %c0_i32_0 = arith.constant 0 : i32
    return %arg0, %c0_i32 : i32, i32
  }
}

</mosaic_0001>

<bundles_post_ra>
// kernel: tpu_custom_call.1
= control target key start
LH: loop header
LB: loop body
LE: loop exit
PB: predicated region body
PF: predicated region fallthrough
CT: control target
= control target key end

     0   :  { %8 = vsyncpa [#allocation3], 0  ;;  %s271_s0 = inlined_call_operand.hbm [shape: f32[8,128], index: 0, kind: input, shape index: {}]   ;;  %s272_s1 = inlined_call_operand.hbm [shape: f32[4,128], index: 1, kind: input, shape index: {}]   ;;  %s273_s2 = inlined_call_operand.hbm [shape: f32[4,128], index: 2, kind: input, shape index: {}]   ;;  %s274_s3 = inlined_call_operand.hbm [shape: f32[8,128], index: 3, kind: output, shape index: {}]  }
   0x1   :  { %9 = vsyncpa [#allocation6], 0  ;;  %s27_s14 = sshll.u32 %s272_s1, 4  ;;  %s28_s14 = int_to_ptr.hbm [resolvable:$true] %s27_s14 }
   0x2   :  { %10 = vsyncpa [#allocation4], 0  ;;  %s235_s15 = smov [#allocation5]   ;;  %s16_s19 = sshll.u32 %s271_s0, 4  ;;  %s17_s19 = int_to_ptr.hbm [resolvable:$true] %s16_s19 }
   0x3   :  { %s29_s16 = sshll.u32 %s235_s15, 4  ;;  %s236_s20 = smov [#allocation2]   ;;  %s30_s16 = int_to_ptr.vmem [resolvable:$true] %s29_s16 }
   0x4   :  { %32 = dma.hbm_to_vmem [thread:$0]  %s28_s14, 64, %s30_s16, [#allocation6]  }
   0x5   :  { %s18_s21 = sshll.u32 %s236_s20, 4  ;;  %s38_s24 = sshll.u32 %s273_s2, 4  ;;  %s19_s21 = int_to_ptr.vmem [resolvable:$true] %s18_s21  ;;  %s39_s24 = int_to_ptr.hbm [resolvable:$true] %s38_s24 }
   0x6   :  { %21 = dma.hbm_to_vmem [thread:$0]  %s17_s19, 128, %s19_s21, [#allocation3]  }
   0x7   :  { %s237_s1 = smov [#allocation7]  }
   0x8   :  { %s40_s25 = sshll.u32 %s237_s1, 4  ;;  %s41_s25 = int_to_ptr.vmem [resolvable:$true] %s40_s25 }
   0x9   :  { %43 = dma.hbm_to_vmem [thread:$0]  %s39_s24, 64, %s41_s25, [#allocation6]  }
   0xa   :  { %229 = dma.done.wait [#allocation3], 128  }
   0xb   :  { %230 = vsyncadd [#allocation3], 4294967168 }
   0xc   :  { %231 = dma.done.wait [#allocation6], 128  }
   0xd   :  { %232 = vsyncadd [#allocation6], 4294967168  ;;  %v57_v0 = vld [vmem:[#allocation5] sm:$0xf]  ;;  %v56_v1 = vld [vmem:[#allocation2] sm:$0xff]  ;;  %vm84_vm0 = vcmask 1043456  }
   0xe   :  { %73 = vmatpush.xpose.msra.mxu0 %v57_v0  ;;  %v79_v2 = vld [vmem:[#allocation7] sm:$0xf]  ;;  %vm80_vm1 = vcmask 31744   ;;  %s238_s0 = smov [#allocation8]   ;;  %s116_s28 = sshll.u32 %s274_s3, 4  ;;  %s117_s28 = int_to_ptr.hbm [resolvable:$true] %s116_s28 }
   0xf   :  { %127 = vmatpush.msk.msra.mxu1 %vm84_vm0, %v79_v2  ;;  %s114_s2 = sshll.u32 %s238_s0, 4  ;;  %s115_s2 = int_to_ptr.vmem [resolvable:$true] %s114_s2 }
  0x11   :  { %74 = vmatmul.f32.vlgmr.msra.gmra.mxu0 %v56_v1 }
  0x8e   :  { %v75_v3 = vpop.f32.mrf.mxu0 }
  0x8f   :  { %v78_v4 = vmul.f32 2.0, %v75_v3 }
  0x91   :  { %128 = vmatmul.msk.f32.vlgmr.msra.gmra.mxu1 %vm80_vm1, %v78_v4 }
 0x10e   :  { %v105_v5 = vpop.f32.mrf.mxu1 }
 0x10f   :  { %108 = vst [vmem:[#allocation8] sm:$0xff] %v105_v5 }
 0x110   :  { %119 = dma.vmem_to_hbm [thread:$0]  %s115_s2, 128, %s117_s28, [#allocation4]  }
 0x111   :  { %233 = dma.done.wait [#allocation4], 128  }
 0x112   :  { %234 = vsyncadd [#allocation4], 4294967168 }
 0x113   :  { %124 = vsyncpa [#allocation3], 1 }
 0x114   :  { %125 = vsyncpa [#allocation6], 1 }
 0x115   :  { %126 = vsyncpa [#allocation4], 1 }

</bundles_post_ra>
